<compile_context>
chip_gen: v6e
topology: v6e:2x2x1
jax: 0.10.0
libtpu: 0.0.40
codegen_flags: <defaults>
</compile_context>

<pallas_src>
import math
import functools

import jax
import jax.numpy as jnp
from jax.experimental import pallas as pl
from jax.experimental.pallas import tpu as pltpu


# ---------------------------------------------------------------------------
# helpers
# ---------------------------------------------------------------------------
def _round_up(x, m):
    return ((x + m - 1) // m) * m


def _pick_tile(dim, desired, align):
    """Largest tile <= desired that divides `dim` and is a multiple of `align`.
    Callers guarantee `dim % align == 0` (seq is padded to a multiple of 8), so the
    full-dim fallback is only hit for non-128-multiple hidden sizes."""
    if dim <= desired:
        return dim
    t = (desired // align) * align
    while t >= align:
        if dim % t == 0:
            return t
        t -= align
    return dim


# ---------------------------------------------------------------------------
# Tiled matmul kernel (QKV projection / o_proj)
# ---------------------------------------------------------------------------
def _matmul_kernel(x_ref, w_ref, o_ref, acc_ref):
    @pl.when(pl.program_id(2) == 0)
    def _init():
        acc_ref[...] = jnp.zeros(acc_ref.shape, acc_ref.dtype)

    acc_ref[...] += jnp.dot(
        x_ref[...], w_ref[...], preferred_element_type=jnp.float32
    )

    @pl.when(pl.program_id(2) == pl.num_programs(2) - 1)
    def _finalize():
        o_ref[...] = acc_ref[...].astype(o_ref.dtype)


def pallas_matmul(x, w, *, tm=256, tn=256, tk=512):
    """x: (M, K), w: (K, N) -> (M, N), tiled with an f32 accumulator."""
    M, K = x.shape
    K2, N = w.shape
    assert K == K2
    tm = _pick_tile(M, tm, 8)      # sublane dim of x / out
    tn = _pick_tile(N, tn, 128)    # lane dim of w / out
    tk = _pick_tile(K, tk, 128)    # lane dim of x, sublane dim of w
    grid = (M // tm, N // tn, K // tk)
    itemsize = x.dtype.itemsize
    bytes_accessed = (M * K + K * N + M * N) * itemsize

    return pl.pallas_call(
        _matmul_kernel,
        out_shape=jax.ShapeDtypeStruct((M, N), x.dtype),
        grid_spec=pltpu.PrefetchScalarGridSpec(
            num_scalar_prefetch=0,
            grid=grid,
            in_specs=[
                pl.BlockSpec((tm, tk), lambda i, j, k: (i, k)),
                pl.BlockSpec((tk, tn), lambda i, j, k: (k, j)),
            ],
            out_specs=pl.BlockSpec((tm, tn), lambda i, j, k: (i, j)),
            scratch_shapes=[pltpu.VMEM((tm, tn), jnp.float32)],
        ),
        compiler_params=pltpu.CompilerParams(
            dimension_semantics=("parallel", "parallel", "arbitrary")
        ),
        cost_estimate=pl.CostEstimate(
            flops=2 * M * N * K, transcendentals=0, bytes_accessed=bytes_accessed
        ),
    )(x, w)


# ---------------------------------------------------------------------------
# Rotary-embedding kernel (applied once, over Q/K column blocks of the QKV slab)
# ---------------------------------------------------------------------------
def _rope_kernel(x_ref, cos_ref, sin_ref, o_ref, *, half, nh, q_scale):
    # x_ref block: (1, bs, D) -> one head's Q or K columns of the qkv slab.
    x = x_ref[0].astype(jnp.float32)                          # (bs, D)
    # rotate_half(x) == roll(x, D/2) with the sign pre-folded into the sin table.
    rolled = pltpu.roll(x, shift=half, axis=1)                # XLU slot
    out = x * cos_ref[0] + rolled * sin_ref[0]
    # Fold the 1/sqrt(D) softmax scale into Q here so the attention kernel never
    # rescales the (bq, bk) score matrix.  Column blocks [0, nh) are Q, [nh, 2nh) K.
    scale = jnp.where(pl.program_id(1) < nh, q_scale, 1.0)
    o_ref[0] = (out * scale).astype(o_ref.dtype)


def pallas_rope(qkv, cos_full, sin_signed_full, num_heads, head_dim, q_scale,
                *, block_s=512):
    """qkv: (B, S, 3*NH*D); cos/sin: (B, S, D) f32 (sin has the rotate-half sign
    folded in).  Returns (B, S, 2*NH*D) holding rotated+scaled Q and rotated K."""
    B, S, three_h = qkv.shape
    NH, D = num_heads, head_dim
    H = NH * D
    assert three_h == 3 * H
    bs = _pick_tile(S, block_s, 8)
    ns = S // bs

    x_spec = pl.BlockSpec((1, bs, D), lambda b, c, si: (b, si, c))
    t_spec = pl.BlockSpec((1, bs, D), lambda b, c, si: (b, si, 0))
    o_spec = pl.BlockSpec((1, bs, D), lambda b, c, si: (b, si, c))

    kernel = functools.partial(_rope_kernel, half=D // 2, nh=NH, q_scale=q_scale)
    return pl.pallas_call(
        kernel,
        out_shape=jax.ShapeDtypeStruct((B, S, 2 * H), qkv.dtype),
        grid_spec=pltpu.PrefetchScalarGridSpec(
            num_scalar_prefetch=0,
            grid=(B, 2 * NH, ns),
            in_specs=[x_spec, t_spec, t_spec],
            out_specs=o_spec,
        ),
        compiler_params=pltpu.CompilerParams(
            dimension_semantics=("parallel", "parallel", "parallel")
        ),
    )(qkv, cos_full, sin_signed_full)


# ---------------------------------------------------------------------------
# Flash attention kernel (causal, reads the QKV slab, writes (B, S, H))
# ---------------------------------------------------------------------------
def _flash_attn_kernel(q_ref, k_ref, v_ref, o_ref, m_ref, l_ref, acc_ref,
                       *, block_q, block_k):
    qi = pl.program_id(2)
    ki = pl.program_id(3)

    @pl.when(ki == 0)
    def _init():
        m_ref[...] = jnp.full(m_ref.shape, -jnp.inf, m_ref.dtype)
        l_ref[...] = jnp.zeros(l_ref.shape, l_ref.dtype)
        acc_ref[...] = jnp.zeros(acc_ref.shape, acc_ref.dtype)

    q_start = qi * block_q
    k_start = ki * block_k
    q_end = q_start + (block_q - 1)
    k_end = k_start + (block_k - 1)

    def step(apply_mask):
        q = q_ref[0]                                   # (bq, D) RoPE'd, pre-scaled
        k = k_ref[0]                                   # (bk, D) RoPE'd
        v = v_ref[0]                                   # (bk, D)
        # QK^T as a contraction over D (no in-kernel transpose of k).
        s = jax.lax.dot_general(
            q, k, (((1,), (1,)), ((), ())),
            preferred_element_type=jnp.float32,
        )                                              # (bq, bk)
        if apply_mask:
            row = q_start + jax.lax.broadcasted_iota(jnp.int32, s.shape, 0)
            col = k_start + jax.lax.broadcasted_iota(jnp.int32, s.shape, 1)
            s = jnp.where(col <= row, s, -1e30)
        # --- online softmax update ---
        m_prev = m_ref[...]                            # (bq, 1)
        m_new = jnp.maximum(m_prev, jnp.max(s, axis=-1, keepdims=True))
        alpha = jnp.exp(m_prev - m_new)
        p = jnp.exp(s - m_new)
        l_ref[...] = alpha * l_ref[...] + jnp.sum(p, axis=-1, keepdims=True)
        acc_ref[...] = alpha * acc_ref[...] + jax.lax.dot_general(
            p.astype(v.dtype), v, (((1,), (0,)), ((), ())),
            preferred_element_type=jnp.float32,
        )
        m_ref[...] = m_new

    # Diagonal-straddling blocks: need the causal mask.
    @pl.when(jnp.logical_and(k_start <= q_end, k_end > q_start))
    def _masked():
        step(True)

    # Fully-below-diagonal blocks: no mask work at all.
    @pl.when(k_end <= q_start)
    def _unmasked():
        step(False)

    # Fully-above-diagonal blocks (k_start > q_end) do no compute; the clamped kv
    # index_map keeps the previous K/V tile resident so no DMA is issued either.

    @pl.when(ki == pl.num_programs(3) - 1)
    def _finalize():
        inv_l = pl.reciprocal(l_ref[...], approx=True)      # EUP slot
        o_ref[0] = (acc_ref[...] * inv_l).astype(o_ref.dtype)


def pallas_flash_attention(qk_rot, qkv, num_heads, head_dim,
                           *, block_q=256, block_k=128):
    """qk_rot: (B, S, 2*NH*D) rotated Q|K; qkv: (B, S, 3*NH*D) (V columns used).
    Causal self-attention.  Returns (B, S, NH*D) in head-concatenated layout."""
    B, S, _ = qkv.shape
    NH, D = num_heads, head_dim
    H = NH * D
    bq = _pick_tile(S, block_q, 8)
    bk = _pick_tile(S, block_k, 8)
    nq, nk = S // bq, S // bk

    def kv_block(qi, ki):
        # Causal clamp: never DMA a fully-masked K/V tile — reuse the resident one.
        return jnp.minimum(ki, ((qi + 1) * bq - 1) // bk)

    # TODO(synk): for head_dim < 128 pack ceil(128/D) heads per grid step so the
    #             output store stays lane-dense (no-op for D >= 128 models).
    q_spec = pl.BlockSpec((1, bq, D), lambda b, h, qi, ki: (b, qi, h))
    k_spec = pl.BlockSpec((1, bk, D), lambda b, h, qi, ki: (b, kv_block(qi, ki), NH + h))
    v_spec = pl.BlockSpec((1, bk, D), lambda b, h, qi, ki: (b, kv_block(qi, ki), 2 * NH + h))
    o_spec = pl.BlockSpec((1, bq, D), lambda b, h, qi, ki: (b, qi, h))

    kernel = functools.partial(_flash_attn_kernel, block_q=bq, block_k=bk)
    itemsize = qkv.dtype.itemsize
    cost = pl.CostEstimate(
        flops=2 * B * NH * S * S * D,                 # ~causal half of 4*B*NH*S*S*D
        transcendentals=B * NH * S * S // 2,
        bytes_accessed=4 * B * S * H * itemsize,
    )

    return pl.pallas_call(
        kernel,
        out_shape=jax.ShapeDtypeStruct((B, S, H), qkv.dtype),
        grid_spec=pltpu.PrefetchScalarGridSpec(
            num_scalar_prefetch=0,
            grid=(B, NH, nq, nk),
            in_specs=[q_spec, k_spec, v_spec],
            out_specs=o_spec,
            scratch_shapes=[
                pltpu.VMEM((bq, 1), jnp.float32),   # m (running max)
                pltpu.VMEM((bq, 1), jnp.float32),   # l (running denom)
                pltpu.VMEM((bq, D), jnp.float32),   # acc
            ],
        ),
        compiler_params=pltpu.CompilerParams(
            dimension_semantics=("parallel", "parallel", "parallel", "arbitrary")
        ),
        cost_estimate=cost,
    )(qk_rot, qk_rot, qkv)


# ---------------------------------------------------------------------------
# Module
# ---------------------------------------------------------------------------
def rotate_half(x):
    half = x.shape[-1] // 2
    return jnp.concatenate([-x[..., half:], x[..., :half]], axis=-1)


class QuantAttentionFused:
    """JAX/Pallas port of MixQ QuantAttentionFused forward (inference path)."""

    def __init__(self, hidden_size, n_heads, n_kv_heads, w_qkv, w_o, max_seq_len,
                 attn_block_q=256, attn_block_k=128,
                 mm_tm=256, mm_tn=256, mm_tk=512,
                 compute_dtype=None):
        assert n_kv_heads == n_heads, "this port assumes n_kv_heads == n_heads"
        self.hidden_size = hidden_size
        self.num_heads = n_heads
        self.head_dim = hidden_size // n_heads
        if self.head_dim * self.num_heads != self.hidden_size:
            raise ValueError("hidden_size must be divisible by num_heads")
        self.max_position_embeddings = max_seq_len
        self.attn_block_q = attn_block_q
        self.attn_block_k = attn_block_k
        self.mm_tm, self.mm_tn, self.mm_tk = mm_tm, mm_tn, mm_tk
        # Optional bf16 compute path (cast weights/activations; f32 MXU accumulation).
        self.compute_dtype = compute_dtype
        if compute_dtype is not None:
            w_qkv = w_qkv.astype(compute_dtype)
            w_o = w_o.astype(compute_dtype)
        self.w_qkv = w_qkv  # (H, 3H), pre-transposed Linear weight (no bias)
        self.w_o = w_o      # (H, H)
        # TODO(synk): quantized (int8/int4) MixGemm weight path not ported; on v7x the
        # MXU is fp8-only so quantized weights would need a dequant prologue anyway.

        # RotaryEmbedding cache (matches torch RotaryEmbedding.__init__).
        D = self.head_dim
        inv_freq = 1.0 / (
            10000.0 ** (jnp.arange(0, D, 2, dtype=jnp.float32) / D)
        )
        t = jnp.arange(max_seq_len, dtype=jnp.float32)
        freqs = jnp.outer(t, inv_freq)
        emb = jnp.concatenate([freqs, freqs], axis=-1)
        self.cos_cached = jnp.cos(emb).astype(jnp.float32)   # (max_seq, D)
        self.sin_cached = jnp.sin(emb).astype(jnp.float32)
        half = D // 2
        # rotate_half sign pre-folded into the sin table used by the RoPE kernel.
        self.sin_signed_cached = jnp.concatenate(
            [-self.sin_cached[:, :half], self.sin_cached[:, half:]], axis=-1
        )

    def __call__(
        self,
        hidden_states,
        attention_mask=None,
        position_ids=None,
        past_key_value=None,
        output_attentions=False,
        use_cache=False,
        padding_mask=None,
    ):
        # TODO(synk): padding_mask (varlen unpad) path, past_key_value cache update
        # and GQA are not implemented; only the dense causal inference path is ported.
        bsz, q_len, H = hidden_states.shape
        NH, D = self.num_heads, self.head_dim

        if position_ids is None:
            position_ids = jnp.broadcast_to(
                jnp.arange(q_len, dtype=jnp.int32), (bsz, q_len)
            )
        if self.compute_dtype is not None:
            hidden_states = hidden_states.astype(self.compute_dtype)

        # Pad the sequence to a multiple of 8 so every tile obeys the (8,128) rule and
        # _pick_tile never falls back to a full-S (SxS score) tile.  Padded rows are
        # zero (harmless) and padded key columns are causally masked for real rows.
        s_pad = _round_up(q_len, 8)
        if s_pad != q_len:
            hidden_states = jnp.pad(
                hidden_states, ((0, 0), (0, s_pad - q_len), (0, 0))
            )
            position_ids = jnp.pad(position_ids, ((0, 0), (0, s_pad - q_len)))

        # --- W_pack (fused QKV projection); output stays in (B, S, 3*NH*D) slab ---
        qkv = pallas_matmul(
            hidden_states.reshape(bsz * s_pad, H), self.w_qkv,
            tm=self.mm_tm, tn=self.mm_tn, tk=self.mm_tk,
        ).reshape(bsz, s_pad, 3 * H)

        # rotary tables gathered by position_ids (tiny), sign + 1/sqrt(D) folded in.
        cos_full = jnp.take(self.cos_cached, position_ids, axis=0)        # (B,S,D) f32
        sin_full = jnp.take(self.sin_signed_cached, position_ids, axis=0)
        scale = 1.0 / math.sqrt(D)
        qk_rot = pallas_rope(qkv, cos_full, sin_full, NH, D, scale)       # (B,S,2H)

        # --- flash attention core (causal); output already in (B, S, H) layout ---
        attn = pallas_flash_attention(
            qk_rot, qkv, NH, D,
            block_q=self.attn_block_q, block_k=self.attn_block_k,
        )

        # --- o_proj ---
        out = pallas_matmul(
            attn.reshape(bsz * s_pad, H), self.w_o,
            tm=self.mm_tm, tn=self.mm_tn, tk=self.mm_tk,
        ).reshape(bsz, s_pad, H)
        out = out[:, :q_len]

        attn_weights = None
        return out, attn_weights, past_key_value


# ---------------------------------------------------------------------------
# Pure-JAX reference for validation
# ---------------------------------------------------------------------------
def reference_forward(hidden_states, w_qkv, w_o, position_ids, cos_c, sin_c, NH, D):
    B, S, H = hidden_states.shape
    qkv = hidden_states.reshape(B * S, H) @ w_qkv
    qkv = qkv.reshape(B, S, 3, NH, D)
    q = jnp.transpose(qkv[:, :, 0], (0, 2, 1, 3))
    k = jnp.transpose(qkv[:, :, 1], (0, 2, 1, 3))
    v = jnp.transpose(qkv[:, :, 2], (0, 2, 1, 3))
    cos = cos_c[position_ids][:, None, :, :]
    sin = sin_c[position_ids][:, None, :, :]
    q = q * cos + rotate_half(q) * sin
    k = k * cos + rotate_half(k) * sin
    scale = 1.0 / math.sqrt(D)
    s = jnp.einsum("bhqd,bhkd->bhqk", q, k) * scale
    mask = jnp.tril(jnp.ones((S, S), dtype=bool))
    s = jnp.where(mask[None, None], s, -jnp.inf)
    p = jax.nn.softmax(s, axis=-1)
    o = jnp.einsum("bhqk,bhkd->bhqd", p, v)
    o = jnp.transpose(o, (0, 2, 1, 3)).reshape(B, S, H)
    return (o.reshape(B * S, H) @ w_o).reshape(B, S, H)


# ---------------------------------------------------------------------------
if __name__ == "__main__":
    B, NH, D = 2, 2, 128
    H = NH * D           # 256
    S = 60               # pads to 64 -> exercises the padding path
    MAX_SEQ = 128

    key = jax.random.PRNGKey(0)
    k1, k2, k3 = jax.random.split(key, 3)
    hidden_states = jax.random.normal(k1, (B, S, H), dtype=jnp.float32)
    w_qkv = jax.random.normal(k2, (H, 3 * H), dtype=jnp.float32) / math.sqrt(H)
    w_o = jax.random.normal(k3, (H, H), dtype=jnp.float32) / math.sqrt(H)
    position_ids = jnp.broadcast_to(jnp.arange(S, dtype=jnp.int32), (B, S))

    # Small attention tiles (16) so the test exercises online-softmax accumulation,
    # the clamped kv index_map, diagonal-only masking and causal block skipping;
    # mm_tk=128 exercises the matmul K-axis accumulator.
    module = QuantAttentionFused(
        H, NH, NH, w_qkv, w_o, MAX_SEQ,
        attn_block_q=16, attn_block_k=16,
        mm_tm=256, mm_tn=256, mm_tk=128,
    )
    out, attn_weights, past_kv = module(
        hidden_states, None, position_ids, past_key_value=None
    )
    out = jax.block_until_ready(out)

    ref = reference_forward(
        hidden_states, w_qkv, w_o, position_ids,
        module.cos_cached, module.sin_cached, NH, D,
    )
    assert out.shape == (B, S, H)
    max_err = float(jnp.max(jnp.abs(out - ref)))
    assert jnp.allclose(out, ref, atol=2e-2, rtol=2e-2), (
        f"mismatch vs reference (max abs err {max_err})"
    )
    print("KERNEL_OK")
</pallas_src>

<mosaic_0001>
module attributes {stable_mosaic.version = 11 : i64} {
  func.func @_matmul_kernel(%arg0: i32, %arg1: i32, %arg2: i32, %arg3: memref<128x128xf32, #tpu.memory_space<vmem>>, %arg4: memref<128x256xf32, #tpu.memory_space<vmem>>, %arg5: memref<128x256xf32, #tpu.memory_space<vmem>>, %arg6: memref<128x256xf32, #tpu.memory_space<vmem>>) attributes {dimension_semantics = [#tpu.dimension_semantics<parallel>, #tpu.dimension_semantics<parallel>, #tpu.dimension_semantics<arbitrary>], iteration_bounds = array<i64: 1, 3, 2>, scalar_prefetch = 0 : i64, scratch_operands = 1 : i64, tpu.core_type = #tpu.core_type<tc>, window_params = [{transform_indices = @transform_0, window_bounds = array<i64: 128, 128>}, {transform_indices = @transform_1, window_bounds = array<i64: 128, 256>}, {transform_indices = @transform_2, window_bounds = array<i64: 128, 256>}]} {
    %c0_i32 = arith.constant 0 : i32
    %0 = arith.cmpi eq, %arg2, %c0_i32 : i32
    %1 = arith.extui %0 : i1 to i32
    %c0_i32_0 = arith.constant 0 : i32
    %2 = arith.cmpi ne, %1, %c0_i32_0 : i32
    scf.if %2 {
      %cst_9 = arith.constant 0.000000e+00 : f32
      %12 = vector.broadcast %cst_9 : f32 to vector<128x256xf32>
      %c0_10 = arith.constant 0 : index
      %c0_11 = arith.constant 0 : index
      %13 = vector.load %arg6[%c0_10, %c0_11] : memref<128x256xf32, #tpu.memory_space<vmem>>, vector<128x256xf32>
      tpu.vector_store %arg6[%c0_10, %c0_11], %12 {strides = array<i32>} : memref<128x256xf32, #tpu.memory_space<vmem>>, vector<128x256xf32>,
    } else {
    }
    %c0 = arith.constant 0 : index
    %c0_1 = arith.constant 0 : index
    %3 = vector.load %arg6[%c0, %c0_1] : memref<128x256xf32, #tpu.memory_space<vmem>>, vector<128x256xf32>
    %c0_2 = arith.constant 0 : index
    %c0_3 = arith.constant 0 : index
    %4 = vector.load %arg3[%c0_2, %c0_3] : memref<128x128xf32, #tpu.memory_space<vmem>>, vector<128x128xf32>
    %c0_4 = arith.constant 0 : index
    %c0_5 = arith.constant 0 : index
    %5 = vector.load %arg4[%c0_4, %c0_5] : memref<128x256xf32, #tpu.memory_space<vmem>>, vector<128x256xf32>
    %cst = arith.constant dense<0.000000e+00> : vector<128x256xf32>
    %6 = tpu.matmul %4, %5, %cst {dimension_numbers = #tpu.dot_dimension_numbers<[1], [0], [0], [1], [0, 0, 1, 1], [], []>} : vector<128x128xf32>, vector<128x256xf32>, vector<128x256xf32> -> vector<128x256xf32>
    %7 = arith.addf %3, %6 : vector<128x256xf32>
    %c0_6 = arith.constant 0 : index
    %c0_7 = arith.constant 0 : index
    %8 = vector.load %arg6[%c0_6, %c0_7] : memref<128x256xf32, #tpu.memory_space<vmem>>, vector<128x256xf32>
    tpu.vector_store %arg6[%c0_6, %c0_7], %7 {strides = array<i32>} : memref<128x256xf32, #tpu.memory_space<vmem>>, vector<128x256xf32>,
    %c1_i32 = arith.constant 1 : i32
    %9 = arith.cmpi eq, %arg2, %c1_i32 : i32
    %10 = arith.extui %9 : i1 to i32
    %c0_i32_8 = arith.constant 0 : i32
    %11 = arith.cmpi ne, %10, %c0_i32_8 : i32
    scf.if %11 {
      %c0_9 = arith.constant 0 : index
      %c0_10 = arith.constant 0 : index
      %12 = vector.load %arg6[%c0_9, %c0_10] : memref<128x256xf32, #tpu.memory_space<vmem>>, vector<128x256xf32>
      %c0_11 = arith.constant 0 : index
      %c0_12 = arith.constant 0 : index
      %13 = vector.load %arg5[%c0_11, %c0_12] : memref<128x256xf32, #tpu.memory_space<vmem>>, vector<128x256xf32>
      tpu.vector_store %arg5[%c0_11, %c0_12], %12 {strides = array<i32>} : memref<128x256xf32, #tpu.memory_space<vmem>>, vector<128x256xf32>,
    } else {
    }
    return
  }
  func.func @transform_0(%arg0: i32, %arg1: i32, %arg2: i32) -> (i32, i32) {
    %c0_i32 = arith.constant 0 : i32
    return %arg0, %arg2 : i32, i32
  }
  func.func @transform_1(%arg0: i32, %arg1: i32, %arg2: i32) -> (i32, i32) {
    %c0_i32 = arith.constant 0 : i32
    return %arg2, %arg1 : i32, i32
  }
  func.func @transform_2(%arg0: i32, %arg1: i32, %arg2: i32) -> (i32, i32) {
    %c0_i32 = arith.constant 0 : i32
    return %arg0, %arg1 : i32, i32
  }
}

</mosaic_0001>

<bundles_post_ra>
// kernel: tpu_custom_call.1
= control target key start
LH: loop header
LB: loop body
LE: loop exit
PB: predicated region body
PF: predicated region fallthrough
CT: control target
= control target key end

     0   :  { %s1604_s0 = inlined_call_operand.hbm [shape: f32[128,256], index: 0, kind: input, shape index: {}]   ;;  %s1605_s1 = inlined_call_operand.hbm [shape: f32[256,768], index: 1, kind: input, shape index: {}]   ;;  %s1606_s2 = inlined_call_operand.hbm [shape: f32[128,768], index: 2, kind: output, shape index: {}]  }
   0x1   :  { %1615 = sst [smem:[#allocation19_spill]] %s1604_s0 }
   0x2   :  { %1616 = sst [smem:[#allocation20_spill]] %s1606_s2 }
   0x3   :  { %7 = vsyncpa [#allocation4], 0 }
   0x4   :  { %9 = vsyncpa [#allocation4 + $0x1], 0 }
   0x5   :  { %10 = vsyncpa [#allocation7], 0 }
   0x6   :  { %12 = vsyncpa [#allocation7 + $0x1], 0 }
   0x7   :  { %13 = vsyncpa [#allocation5], 0 }
   0x8   :  { %15 = vsyncpa [#allocation5 + $0x1], 0  ;;  %s1212_s9 = smov 0   ;;  %s1214_s10 = smov 0  }
   0x9   :  { %s1216_s11 = smov 0   ;;  %s1218_s12 = smov 0  }
   0xa   :  { %s1220_s13 = smov 0   ;;  %s1222_s14 = smov 0  }
   0xb   :  { %s1224_s15 = smov 0   ;;  %s1226_s16 = smov 0  }
   0xc   :  { %s1228_s17 = smov 0   ;;  %s1230_s18 = smov 0  }
   0xd   :  { %s1232_s19 = smov 0   ;;  %s1234_s20 = smov 0  }
   0xe   :  { %s1236_s21 = smov 0   ;;  %s1238_s22 = smov 0  }
   0xf LB: > { %1617 = sst [smem:[#allocation12_spill]] %s1162_s17  ;;  %s781_s23 = sadd.s32 4294967295, %s1182_s22   ;;  %s1182_s22 = sphi %s1238_s22, %s21_s22   ;;  %s1178_s21 = sphi %s1236_s21, %s1648_s21   ;;  %s1174_s20 = sphi %s1234_s20, %s1658_s20   ;;  %s1170_s19 = sphi %s1232_s19, %s1646_s19   ;;  %s1166_s18 = sphi %s1230_s18, %s1657_s18   ;;  %s1162_s17 = sphi %s1228_s17, %s1645_s17   ;;  %s1158_s16 = sphi %s1226_s16, %s1656_s16   ;;  %s1154_s15 = sphi %s1224_s15, %s1655_s15   ;;  %s1150_s14 = sphi %s1222_s14, %s1654_s14   ;;  %s1146_s13 = sphi %s1220_s13, %s1653_s13   ;;  %s1142_s12 = sphi %s1218_s12, %s1652_s12   ;;  %s1138_s11 = sphi %s1216_s11, %s1651_s11   ;;  %s1134_s10 = sphi %s1214_s10, %s1650_s10   ;;  %s1130_s9 = sphi %s1212_s9, %s1649_s9  }
  0x10   : > { %1618 = sst [smem:[#allocation13_spill]] %s1170_s19  ;;  %s33_s24 = sadd.s32 1, %s1174_s20 }
  0x11   : > { %1619 = sst [smem:[#allocation14_spill]] %s1178_s21  ;;  %p1282_p0 = scmp.ge.s32.totalorder %s33_s24, 2 }
  0x12   : > { %s49_s26 = sadd.s32 1, %s1162_s17  ;;  %p56_p1 = scmp.ne.s32.totalorder %s1162_s17, %s1158_s16 }
  0x13   : > { %p1610_p2 = scmp.eq.s32.totalorder %s1182_s22, 0  ;;  %s1660_s24 = smov (%p1282_p0, %s33_s24), 0 }
  0x14   : > { %1621 = sst [smem:[#allocation15_spill]] %s1660_s24  ;;  %p62_p4 = scmp.ne.s32.totalorder %s1158_s16, %s1154_s15 }
  0x15   : > { %p1296_p3 = por %p1610_p2, %p56_p1  ;;  %s1303_s28 = ssub.s32 %s1174_s20, %s1660_s24 }
  0x16   : > { %p1305_p5 = scmp.eq.s32.totalorder %s781_s23, 0  ;;  %p47_p6 = scmp.eq.s32.totalorder %s1303_s28, 0 }
  0x17   : > { %p1310_p7 = scmp.eq.s32.totalorder %s781_s23, 5  ;;  %p854_p9 = scmp.lt.s32.totalorder %s1182_s22, 6 }
  0x18   : > { %p1316_p8 = por %p1305_p5, %p62_p4  ;;  %s142_s5 = sand.u32 1, %s1162_s17  }
  0x19   : > { %s1321_s4 = scalar_select %p47_p6, %s1162_s17, %s49_s26  }
  0x1a   : > { %s1625_s3 = scalar_select %p1316_p8, 1, 0 }
  0x1b   : > { %1626 = sst [smem:[#allocation16_spill]] %s1321_s4  ;;  %s785_s6 = sshll.u32 %s142_s5, 7 }
  0x1c   : > { %s786_s7 = sshll.u32 %s1174_s20, 7  ;;  %s1627_s0 = sld [smem:[#allocation19_spill]] }
  0x1d   : > { %s146_s2 = scalar_lea.vmem [#allocation3], %s785_s6  ;;  %p1333_p10 = pnand %p854_p9, %p1296_p3 }
  0x1e   : > { %s155_s23 = sshll.u32 %s146_s2, 4  ;;  %s143_s26 = scalar_lea.sflag [#allocation4], %s142_s5  ;;  %s156_s23 = int_to_ptr.vmem [resolvable:$true] %s155_s23 }
  0x1f   : > { %p980_p11 = pneg %p1333_p10  ;;  %s991_s4 = scalar_lea.vmem %s156_s23, 2048 }
  0x20   : > { %p992_p12 = scmp.ne.s32.totalorder %s156_s23, %s991_s4  ;;  %s1184_s17 = smov [#allocation3]  }
  0x21   : > { %s996_s8 = sshll.u32 %s1184_s17, 4  ;;  %s997_s8 = int_to_ptr.vmem [resolvable:$false] %s996_s8 }
  0x22   : > { %s154_s24 = scalar_lea.hbm %s1627_s0, %s786_s7  ;;  %p994_p13 = pnand %p992_p12, %p980_p11 }
  0x23   : > { %s998_s6 = scalar_lea.vmem %s997_s8, 4096  ;;  %p999_p4 = scmp.lt.s32.totalorder %s156_s23, %s997_s8 }
  0x24   : > { %p995_p1 = pneg %p994_p13  ;;  %p1000_p6 = scmp.lt.s32.totalorder %s998_s6, %s991_s4 }
  0x26   : > { %p1001_p2 = por %p1000_p6, %p999_p4 }
  0x28   : > { %p1002_p8 = pnand %p1001_p2, %p995_p1 }
  0x2a   : > { %1005 = shalt.err (!%p1002_p8)
}
  0x2b   : > { %s1612_s2 = smov 256   ;;  %s1186_s17 = smov 128  }
  0x2c   : > { %s1187_s27 = smov 8   ;;  %p792_p2 = scmp.ge.s32.totalorder %s1182_s22, 1 }
  0x2d   : > { %846 = dma.hbm_to_vmem [thread:$0]  (!%p1333_p10), %s154_s24, 2048, %s156_s23, %s143_s26, %s1612_s2, %s1186_s17, %s1187_s27  }
  0x2e   : > { %p187_p3 = scmp.lt.s32.totalorder %s1182_s22, 7  ;;  %s782_s5 = sadd.s32 4294967294, %s1182_s22  }
  0x2f   : > { %s36_s7 = sadd.s32 1, %s1178_s21  ;;  %s77_s15 = sadd.s32 1, %s1150_s14 }
  0x30   : > { %p1344_p8 = pnand %p792_p2, %p187_p3  ;;  %s1662_s7 = smov (!%p1282_p0, %s36_s7), %s1178_s21 }
  0x31   : > { %p84_p11 = scmp.ne.s32.totalorder %s1150_s14, %s1146_s13  ;;  %p90_p10 = scmp.ne.s32.totalorder %s1146_s13, %s1142_s12 }
  0x32   : > { %p38_p12 = scmp.ge.s32.totalorder %s1662_s7, 3  ;;  %s105_s19 = sadd.s32 1, %s1138_s11 }
  0x33   : > { %p1630_p13 = scmp.eq.s32.totalorder %s1182_s22, 0  ;;  %p1367_p4 = por %p90_p10, %p1305_p5 }
  0x34   : > { %s1664_s7 = smov (%p38_p12, %s1662_s7), 0  ;;  %p115_p0 = scmp.ne.s32.totalorder %s1138_s11, %s1134_s10 }
  0x35   : > { %p1361_p1 = por %p84_p11, %p1630_p13  ;;  %1633 = sst [smem:[#allocation17_spill]] %s1664_s7 }
  0x36   : > { %p121_p6 = scmp.ne.s32.totalorder %s1134_s10, %s1130_s9  ;;  %s73_s12 = ssub.s32 %s1178_s21, %s1664_s7 }
  0x37   : > { %p122_p2 = scmp.eq.s32.totalorder %s782_s5, 5  ;;  %s74_s25 = sor.u32 %s73_s12, %s1303_s28 }
  0x38   : > { %p103_p3 = scmp.eq.s32.totalorder %s73_s12, 0  ;;  %p75_p11 = scmp.eq.s32.totalorder %s74_s25, 0 }
  0x39   : > { %p1382_p13 = por %p1310_p7, %p115_p0  ;;  %p1392_p5 = por %p122_p2, %p121_p6 }
  0x3a   : > { %s1387_s26 = scalar_select %p103_p3, %s1138_s11, %s105_s19  }
  0x3b   : > { %s1390_s8 = scalar_select %p75_p11, %s1150_s14, %s77_s15  }
  0x3c   : > { %s165_s17 = sand.u32 1, %s1150_s14   ;;  %s789_s2 = sshll.u32 %s1178_s21, 1 }
  0x3d   : > { %1635 = sst [smem:[#allocation18_spill]] %s1390_s8  ;;  %s787_s27 = sshll.u32 %s165_s17, 8 }
  0x3e   : > { %s836_s5 = smul.u32 96, %s1174_s20  ;;  %s169_s28 = scalar_lea.vmem [#allocation6], %s787_s27 }
  0x3f   : > { %s179_s12 = sshll.u32 %s169_s28, 4  ;;  %p1403_p7 = pnand %p854_p9, %p1361_p1  ;;  %s180_s12 = int_to_ptr.vmem [resolvable:$true] %s179_s12 }
  0x40   : > { %s176_s15 = sadd.s32 %s836_s5, %s789_s2  ;;  %s166_s8 = scalar_lea.sflag [#allocation7], %s165_s17 }
  0x41   : > { %s791_s19 = sshll.u32 %s176_s15, 7  ;;  %p1008_p10 = pneg %p1403_p7 }
  0x42   : > { %s178_s7 = scalar_lea.hbm %s1605_s1, %s791_s19  ;;  %s1019_s21 = scalar_lea.vmem %s180_s12, 4096 }
  0x43   : > { %p1020_p12 = scmp.ne.s32.totalorder %s180_s12, %s1019_s21  ;;  %s1188_s24 = smov [#allocation6]  }
  0x44   : > { %s1024_s27 = sshll.u32 %s1188_s24, 4  ;;  %s1025_s27 = int_to_ptr.vmem [resolvable:$false] %s1024_s27 }
  0x45   : > { %p1022_p0 = pnand %p1020_p12, %p1008_p10  ;;  %s1026_s28 = scalar_lea.vmem %s1025_s27, 8192 }
  0x46   : > { %p1027_p9 = scmp.lt.s32.totalorder %s180_s12, %s1025_s27  ;;  %p1028_p1 = scmp.lt.s32.totalorder %s1026_s28, %s1019_s21 }
  0x47   : > { %p1023_p6 = pneg %p1022_p0 }
  0x48   : > { %p1029_p2 = por %p1028_p1, %p1027_p9 }
  0x4a   : > { %p1030_p3 = pnand %p1029_p2, %p1023_p6 }
  0x4c   : > { %1033 = shalt.err (!%p1030_p3)
}
  0x4d   : > { %s1189_s2 = smov 768   ;;  %s1190_s0 = smov 16  }
  0x4e   : > { %s1638_s17 = smov 256   ;;  %191 = sbr.rel (%p1344_p8) target bundleno = 415 (0x19f), region = 28 }
  0x4f   : > { %849 = dma.hbm_to_vmem [thread:$0]  (!%p1403_p7), %s178_s7, 4096, %s180_s12, %s166_s8, %s1189_s2, %s1638_s17, %s1190_s0  }
  0x50   : > { %s193_s5 = sand.u32 (!%p1344_p8), 1, %s1158_s16   ;;  %p1639_p11 = scmp.ne.s32.totalorder (!%p1344_p8), %s1625_s3, 0 }
  0x51   : > { %s793_s15 = sshll.u32 (!%p1344_p8), %s193_s5, 7  ;;  %s194_s19 = scalar_lea.sflag (!%p1344_p8), [#allocation4], %s193_s5 }
  0x52   : > { %s1418_s25 = scalar_lea.vmem (!%p1344_p8), [#allocation3], %s793_s15 }
  0x53   : > { %1117 = dma.done.wait (%p1639_p11), %s194_s19, 2048  }
  0x54   : > { %1119 = vsyncadd (%p1639_p11), %s194_s19, 4294965248  ;;  %s202_s21 = sand.u32 1, %s1146_s13  }
  0x55   : > { %s794_s30 = sshll.u32 %s202_s21, 8  ;;  %s203_s7 = scalar_lea.sflag [#allocation7], %s202_s21 }
  0x56   : > { %s1425_s8 = scalar_lea.vmem [#allocation6], %s794_s30 }
  0x57   : > { %1121 = dma.done.wait (%p1367_p4), %s203_s7, 4096  }
  0x58   : > { %1123 = vsyncadd (%p1367_p4), %s203_s7, 4294963200  ;;  %s229_s4 = sand.u32 1, %s1134_s10   ;;  %p796_p8 = scmp.ne.s32.totalorder %s1166_s18, 0 }
  0x59   : > { %s795_s12 = sshll.u32 %s229_s4, 8 }
  0x5a   : > { %s1434_s24 = scalar_lea.vmem [#allocation8], %s795_s12  ;;  %240 = sbr.rel (%p796_p8) target bundleno = 112 (0x70), region = 40 }
  0x5f   : > { %v1191_v0 = vmov 0.0  }
  0x60   : > { %241 = vst [vmem:[#allocation2 + $0xb0] sm:$0xff] %v1191_v0  ;;  %242 = vst [vmem:[#allocation2] sm:$0xff] %v1191_v0 }
  0x61   : > { %243 = vst [vmem:[#allocation2 + $0xd8] sm:$0xff] %v1191_v0  ;;  %244 = vst [vmem:[#allocation2 + $0x18] sm:$0xff] %v1191_v0 }
  0x62   : > { %245 = vst [vmem:[#allocation2 + $0x50] sm:$0xff] %v1191_v0  ;;  %246 = vst [vmem:[#allocation2 + $0x68] sm:$0xff] %v1191_v0 }
  0x63   : > { %247 = vst [vmem:[#allocation2 + $0x30] sm:$0xff] %v1191_v0  ;;  %248 = vst [vmem:[#allocation2 + $0x48] sm:$0xff] %v1191_v0 }
  0x64   : > { %249 = vst [vmem:[#allocation2 + $0x80] sm:$0xff] %v1191_v0  ;;  %250 = vst [vmem:[#allocation2 + $0x88] sm:$0xff] %v1191_v0 }
  0x65   : > { %251 = vst [vmem:[#allocation2 + $0xe8] sm:$0xff] %v1191_v0  ;;  %252 = vst [vmem:[#allocation2 + $0xb8] sm:$0xff] %v1191_v0 }
  0x66   : > { %253 = vst [vmem:[#allocation2 + $0x60] sm:$0xff] %v1191_v0  ;;  %254 = vst [vmem:[#allocation2 + $0xf0] sm:$0xff] %v1191_v0 }
  0x67   : > { %255 = vst [vmem:[#allocation2 + $0x8] sm:$0xff] %v1191_v0  ;;  %256 = vst [vmem:[#allocation2 + $0x78] sm:$0xff] %v1191_v0 }
  0x68   : > { %257 = vst [vmem:[#allocation2 + $0x38] sm:$0xff] %v1191_v0  ;;  %258 = vst [vmem:[#allocation2 + $0x58] sm:$0xff] %v1191_v0 }
  0x69   : > { %259 = vst [vmem:[#allocation2 + $0x40] sm:$0xff] %v1191_v0  ;;  %260 = vst [vmem:[#allocation2 + $0xc8] sm:$0xff] %v1191_v0 }
  0x6a   : > { %261 = vst [vmem:[#allocation2 + $0xe0] sm:$0xff] %v1191_v0  ;;  %262 = vst [vmem:[#allocation2 + $0x90] sm:$0xff] %v1191_v0 }
  0x6b   : > { %263 = vst [vmem:[#allocation2 + $0x70] sm:$0xff] %v1191_v0  ;;  %264 = vst [vmem:[#allocation2 + $0xc0] sm:$0xff] %v1191_v0 }
  0x6c   : > { %265 = vst [vmem:[#allocation2 + $0xa8] sm:$0xff] %v1191_v0  ;;  %266 = vst [vmem:[#allocation2 + $0xd0] sm:$0xff] %v1191_v0 }
  0x6d   : > { %267 = vst [vmem:[#allocation2 + $0x10] sm:$0xff] %v1191_v0  ;;  %268 = vst [vmem:[#allocation2 + $0x28] sm:$0xff] %v1191_v0 }
  0x6e   : > { %269 = vst [vmem:[#allocation2 + $0xa0] sm:$0xff] %v1191_v0  ;;  %270 = vst [vmem:[#allocation2 + $0xf8] sm:$0xff] %v1191_v0 }
  0x6f   : > { %271 = vst [vmem:[#allocation2 + $0x20] sm:$0xff] %v1191_v0  ;;  %272 = vst [vmem:[#allocation2 + $0x98] sm:$0xff] %v1191_v0 }
  0x70 PF: > { %v352_v1 = vld [vmem:[%s1425_s8 + $0xf8] sm:$0xff]  ;;  %v351_v2 = vld [vmem:[%s1425_s8 + $0xf0] sm:$0xff]  ;;  %v350_v3 = vld [vmem:[%s1425_s8 + $0xe8] sm:$0xff]  ;;  %v1192_v35 = vmov 0.0   ;;  %p797_p4 = scmp.ne.s32.totalorder %s1166_s18, 1 }
  0x71   : > { %353 = vmatprep.subr.mxu0 %v352_v1  ;;  %804 = vmatprep.subr.mxu1 %v352_v1  ;;  %v349_v4 = vld [vmem:[%s1425_s8 + $0xe0] sm:$0xff]  ;;  %v348_v5 = vld [vmem:[%s1425_s8 + $0xd8] sm:$0xff]  ;;  %v347_v6 = vld [vmem:[%s1425_s8 + $0xd0] sm:$0xff] }
  0x72   : > { %354 = vmatpush1.msra.mxu0 %v351_v2  ;;  %820 = vmatpush1.msra.mxu1 %v351_v2  ;;  %v346_v7 = vld [vmem:[%s1425_s8 + $0xc8] sm:$0xff]  ;;  %v345_v8 = vld [vmem:[%s1425_s8 + $0xc0] sm:$0xff]  ;;  %v344_v9 = vld [vmem:[%s1425_s8 + $0xb8] sm:$0xff] }
  0x73   : > { %355 = vmatprep.subr.mxu0 %v350_v3  ;;  %805 = vmatprep.subr.mxu1 %v350_v3  ;;  %v343_v10 = vld [vmem:[%s1425_s8 + $0xb0] sm:$0xff]  ;;  %v342_v11 = vld [vmem:[%s1425_s8 + $0xa8] sm:$0xff]  ;;  %v341_v12 = vld [vmem:[%s1425_s8 + $0xa0] sm:$0xff] }
  0x74   : > { %356 = vmatpush1.msra.mxu0 %v349_v4  ;;  %821 = vmatpush1.msra.mxu1 %v349_v4  ;;  %v340_v13 = vld [vmem:[%s1425_s8 + $0x98] sm:$0xff]  ;;  %v339_v14 = vld [vmem:[%s1425_s8 + $0x90] sm:$0xff]  ;;  %v338_v15 = vld [vmem:[%s1425_s8 + $0x88] sm:$0xff] }
  0x75   : > { %357 = vmatprep.subr.mxu0 %v348_v5  ;;  %806 = vmatprep.subr.mxu1 %v348_v5  ;;  %v337_v16 = vld [vmem:[%s1425_s8 + $0x80] sm:$0xff]  ;;  %v336_v17 = vld [vmem:[%s1425_s8 + $0x78] sm:$0xff]  ;;  %v335_v18 = vld [vmem:[%s1425_s8 + $0x70] sm:$0xff] }
  0x76   : > { %358 = vmatpush1.msra.mxu0 %v347_v6  ;;  %822 = vmatpush1.msra.mxu1 %v347_v6  ;;  %v334_v19 = vld [vmem:[%s1425_s8 + $0x68] sm:$0xff]  ;;  %v333_v20 = vld [vmem:[%s1425_s8 + $0x60] sm:$0xff]  ;;  %v332_v21 = vld [vmem:[%s1425_s8 + $0x58] sm:$0xff] }
  0x77   : > { %359 = vmatprep.subr.mxu0 %v346_v7  ;;  %807 = vmatprep.subr.mxu1 %v346_v7  ;;  %v331_v22 = vld [vmem:[%s1425_s8 + $0x50] sm:$0xff]  ;;  %v330_v23 = vld [vmem:[%s1425_s8 + $0x48] sm:$0xff]  ;;  %v329_v24 = vld [vmem:[%s1425_s8 + $0x40] sm:$0xff] }
  0x78   : > { %360 = vmatpush1.msra.mxu0 %v345_v8  ;;  %823 = vmatpush1.msra.mxu1 %v345_v8  ;;  %v328_v25 = vld [vmem:[%s1425_s8 + $0x38] sm:$0xff]  ;;  %v327_v26 = vld [vmem:[%s1425_s8 + $0x30] sm:$0xff]  ;;  %v326_v27 = vld [vmem:[%s1425_s8 + $0x28] sm:$0xff] }
  0x79   : > { %361 = vmatprep.subr.mxu0 %v344_v9  ;;  %808 = vmatprep.subr.mxu1 %v344_v9  ;;  %v325_v28 = vld [vmem:[%s1425_s8 + $0x20] sm:$0xff]  ;;  %v324_v29 = vld [vmem:[%s1425_s8 + $0x18] sm:$0xff]  ;;  %v323_v30 = vld [vmem:[%s1425_s8 + $0x10] sm:$0xff] }
  0x7a   : > { %362 = vmatpush1.msra.mxu0 %v343_v10  ;;  %824 = vmatpush1.msra.mxu1 %v343_v10  ;;  %v322_v31 = vld [vmem:[%s1425_s8 + $0x8] sm:$0xff]  ;;  %v321_v32 = vld [vmem:[%s1425_s8] sm:$0xff]  ;;  %v307_v38 = vld [vmem:[%s1418_s25 + $0x10] sm:$0xff] }
  0x7b   : > { %363 = vmatprep.subr.mxu0 %v342_v11  ;;  %809 = vmatprep.subr.mxu1 %v342_v11  ;;  %v305_v33 = vld [vmem:[%s1418_s25] sm:$0xff]  ;;  %v306_v36 = vld [vmem:[%s1418_s25 + $0x8] sm:$0xff]  ;;  %v315_v39 = vld [vmem:[%s1418_s25 + $0x50] sm:$0xff] }
  0x7c   : > { %364 = vmatpush1.msra.mxu0 %v341_v12  ;;  %825 = vmatpush1.msra.mxu1 %v341_v12  ;;  %v313_v34 = vld [vmem:[%s1418_s25 + $0x40] sm:$0xff]  ;;  %v314_v37 = vld [vmem:[%s1418_s25 + $0x48] sm:$0xff]  ;;  %v308_v40 = vld [vmem:[%s1418_s25 + $0x18] sm:$0xff] }
  0x7d   : > { %365 = vmatprep.subr.mxu0 %v340_v13  ;;  %810 = vmatprep.subr.mxu1 %v340_v13  ;;  %v316_v41 = vld [vmem:[%s1418_s25 + $0x58] sm:$0xff]  ;;  %v309_v42 = vld [vmem:[%s1418_s25 + $0x20] sm:$0xff]  ;;  %v310_v44 = vld [vmem:[%s1418_s25 + $0x28] sm:$0xff] }
  0x7e   : > { %366 = vmatpush1.msra.mxu0 %v339_v14  ;;  %826 = vmatpush1.msra.mxu1 %v339_v14  ;;  %v317_v43 = vld [vmem:[%s1418_s25 + $0x60] sm:$0xff]  ;;  %v318_v45 = vld [vmem:[%s1418_s25 + $0x68] sm:$0xff]  ;;  %v311_v46 = vld [vmem:[%s1418_s25 + $0x30] sm:$0xff] }
  0x7f   : > { %367 = vmatprep.subr.mxu0 %v338_v15  ;;  %811 = vmatprep.subr.mxu1 %v338_v15  ;;  %v319_v47 = vld [vmem:[%s1418_s25 + $0x70] sm:$0xff]  ;;  %v312_v48 = vld [vmem:[%s1418_s25 + $0x38] sm:$0xff]  ;;  %v274_v54 = vld [vmem:[#allocation2] sm:$0xff] }
  0x80   : > { %368 = vmatpush1.msra.mxu0 %v337_v16  ;;  %827 = vmatpush1.msra.mxu1 %v337_v16  ;;  %v320_v49 = vld [vmem:[%s1418_s25 + $0x78] sm:$0xff]  ;;  %v273_v50 = vld [vmem:[#allocation2 + $0xb0] sm:$0xff]  ;;  %v291_v61 = vld [vmem:[#allocation2 + $0x40] sm:$0xff] }
  0x81   : > { %369 = vmatprep.subr.mxu0 %v336_v17  ;;  %812 = vmatprep.subr.mxu1 %v336_v17  ;;  %v289_v51 = vld [vmem:[#allocation2 + $0x38] sm:$0xff]  ;;  %v292_v3 = vld [vmem:[#allocation2 + $0xc8] sm:$0xff]  ;;  %v277_v8 = vld [vmem:[#allocation2 + $0x50] sm:$0xff] }
  0x82   : > { %370 = vmatpush1.msra.mxu0 %v335_v18  ;;  %828 = vmatpush1.msra.mxu1 %v335_v18  ;;  %v290_v55 = vld [vmem:[#allocation2 + $0x58] sm:$0xff]  ;;  %v293_v9 = vld [vmem:[#allocation2 + $0xe0] sm:$0xff]  ;;  %v278_v14 = vld [vmem:[#allocation2 + $0x68] sm:$0xff] }
  0x83   : > { %371 = vmatprep.subr.mxu0 %v334_v19  ;;  %813 = vmatprep.subr.mxu1 %v334_v19  ;;  %v275_v60 = vld [vmem:[#allocation2 + $0xd8] sm:$0xff]  ;;  %v294_v15 = vld [vmem:[#allocation2 + $0x90] sm:$0xff] }
  0x84   : > { %372 = vmatpush1.msra.mxu0 %v333_v20  ;;  %829 = vmatpush1.msra.mxu1 %v333_v20  ;;  %v276_v2 = vld [vmem:[#allocation2 + $0x18] sm:$0xff]  ;;  %v279_v20 = vld [vmem:[#allocation2 + $0x30] sm:$0xff] }
  0x85   : > { %373 = vmatprep.subr.mxu0 %v332_v21  ;;  %814 = vmatprep.subr.mxu1 %v332_v21  ;;  %v295_v21 = vld [vmem:[#allocation2 + $0x70] sm:$0xff] }
  0x86   : > { %374 = vmatpush1.msra.mxu0 %v331_v22  ;;  %830 = vmatpush1.msra.mxu1 %v331_v22 }
  0x87   : > { %375 = vmatprep.subr.mxu0 %v330_v23  ;;  %815 = vmatprep.subr.mxu1 %v330_v23 }
  0x88   : > { %376 = vmatpush1.msra.mxu0 %v329_v24  ;;  %831 = vmatpush1.msra.mxu1 %v329_v24 }
  0x89   : > { %377 = vmatprep.subr.mxu0 %v328_v25  ;;  %816 = vmatprep.subr.mxu1 %v328_v25 }
  0x8a   : > { %378 = vmatpush1.msra.mxu0 %v327_v26  ;;  %832 = vmatpush1.msra.mxu1 %v327_v26  ;;  %v280_v26 = vld [vmem:[#allocation2 + $0x48] sm:$0xff] }
  0x8b   : > { %379 = vmatprep.subr.mxu0 %v326_v27  ;;  %817 = vmatprep.subr.mxu1 %v326_v27  ;;  %v296_v27 = vld [vmem:[#allocation2 + $0xc0] sm:$0xff] }
  0x8c   : > { %380 = vmatpush1.msra.mxu0 %v325_v28  ;;  %833 = vmatpush1.msra.mxu1 %v325_v28 }
  0x8d   : > { %381 = vmatprep.subr.mxu0 %v324_v29  ;;  %818 = vmatprep.subr.mxu1 %v324_v29 }
  0x8e   : > { %382 = vmatpush1.msra.mxu0 %v323_v30  ;;  %834 = vmatpush1.msra.mxu1 %v323_v30 }
  0x8f   : > { %383 = vmatprep.subr.mxu0 %v322_v31  ;;  %819 = vmatprep.subr.mxu1 %v322_v31 }
  0x90   : > { %384 = vmatpush1.msra.mxu0 %v321_v32  ;;  %835 = vmatpush1.msra.mxu1 %v321_v32  ;;  %v281_v32 = vld [vmem:[#allocation2 + $0x80] sm:$0xff] }
  0x91   : > { %417 = vmatprep.mubr.f32.mxu0 %v1192_v35  ;;  %465 = vmatprep.mubr.f32.mxu1 %v1192_v35 }
  0x92   : > { %418 = vmatmul.mubr.f32.vlgmr.msra.gmra.mxu0 %v305_v33  ;;  %466 = vmatmul.mubr.f32.vlgmr.msra.gmra.mxu1 %v313_v34  ;;  %v297_v33 = vld [vmem:[#allocation2 + $0xa8] sm:$0xff] }
  0x93   : > { %423 = vmatprep.mubr.f32.mxu0 %v1192_v35  ;;  %471 = vmatprep.mubr.f32.mxu1 %v1192_v35 }
  0x96   : > { %424 = vmatmul.mubr.f32.gmra.mxu0 %v306_v36  ;;  %472 = vmatmul.mubr.f32.gmra.mxu1 %v314_v37 }
  0x97   : > { %429 = vmatprep.mubr.f32.mxu0 %v1192_v35  ;;  %477 = vmatprep.mubr.f32.mxu1 %v1192_v35 }
  0x9a   : > { %430 = vmatmul.mubr.f32.gmra.mxu0 %v307_v38  ;;  %478 = vmatmul.mubr.f32.gmra.mxu1 %v315_v39  ;;  %v282_v38 = vld [vmem:[#allocation2 + $0x88] sm:$0xff]  ;;  %v298_v39 = vld [vmem:[#allocation2 + $0xd0] sm:$0xff] }
  0x9b   : > { %435 = vmatprep.mubr.f32.mxu0 %v1192_v35  ;;  %483 = vmatprep.mubr.f32.mxu1 %v1192_v35 }
  0x9e   : > { %436 = vmatmul.mubr.f32.gmra.mxu0 %v308_v40  ;;  %484 = vmatmul.mubr.f32.gmra.mxu1 %v316_v41 }
  0x9f   : > { %441 = vmatprep.mubr.f32.mxu0 %v1192_v35  ;;  %489 = vmatprep.mubr.f32.mxu1 %v1192_v35 }
  0xa2   : > { %442 = vmatmul.mubr.f32.gmra.mxu0 %v309_v42  ;;  %490 = vmatmul.mubr.f32.gmra.mxu1 %v317_v43 }
  0xa3   : > { %447 = vmatprep.mubr.f32.mxu0 %v1192_v35  ;;  %495 = vmatprep.mubr.f32.mxu1 %v1192_v35 }
  0xa6   : > { %448 = vmatmul.mubr.f32.gmra.mxu0 %v310_v44  ;;  %496 = vmatmul.mubr.f32.gmra.mxu1 %v318_v45  ;;  %v283_v44 = vld [vmem:[#allocation2 + $0xe8] sm:$0xff]  ;;  %v299_v45 = vld [vmem:[#allocation2 + $0x10] sm:$0xff] }
  0xa7   : > { %453 = vmatprep.mubr.f32.mxu0 %v1192_v35  ;;  %501 = vmatprep.mubr.f32.mxu1 %v1192_v35 }
  0xaa   : > { %454 = vmatmul.mubr.f32.gmra.mxu0 %v311_v46  ;;  %502 = vmatmul.mubr.f32.gmra.mxu1 %v319_v47 }
  0xab   : > { %459 = vmatprep.mubr.f32.mxu0 %v1192_v35  ;;  %507 = vmatprep.mubr.f32.mxu1 %v1192_v35 }
  0xae   : > { %460 = vmatmul.mubr.f32.gmra.mxu0 %v312_v48  ;;  %508 = vmatmul.mubr.f32.gmra.mxu1 %v320_v49 }
 0x152   : > { %v419_v52 = vpop.f32.mrf.mxu0  ;;  %v467_v53 = vpop.f32.mrf.mxu1 }
 0x153   : > { %v514_v56 = vadd.f32 %v419_v52, %v273_v50  ;;  %v530_v57 = vadd.f32 %v467_v53, %v289_v51  ;;  %v284_v50 = vld [vmem:[#allocation2 + $0xb8] sm:$0xff]  ;;  %v300_v51 = vld [vmem:[#allocation2 + $0x28] sm:$0xff] }
 0x154   : > { %v421_v58 = vpop.f32.mrf.mxu0  ;;  %v469_v59 = vpop.f32.mrf.mxu1 }
 0x155   : > { %546 = vst [vmem:[#allocation2 + $0xb0] sm:$0xff] %v514_v56  ;;  %562 = vst [vmem:[#allocation2 + $0x38] sm:$0xff] %v530_v57  ;;  %v515_v62 = vadd.f32 %v421_v58, %v274_v54  ;;  %v531_v63 = vadd.f32 %v469_v59, %v290_v55  ;;  %v285_v56 = vld [vmem:[#allocation2 + $0x60] sm:$0xff] }
 0x156   : > { %v425_v0 = vpop.f32.mrf.mxu0  ;;  %v473_v1 = vpop.f32.mrf.mxu1  ;;  %v301_v57 = vld [vmem:[#allocation2 + $0xa0] sm:$0xff] }
 0x157   : > { %547 = vst [vmem:[#allocation2] sm:$0xff] %v515_v62  ;;  %563 = vst [vmem:[#allocation2 + $0x58] sm:$0xff] %v531_v63  ;;  %v516_v4 = vadd.f32 %v425_v0, %v275_v60  ;;  %v532_v5 = vadd.f32 %v473_v1, %v291_v61  ;;  %v286_v62 = vld [vmem:[#allocation2 + $0xf0] sm:$0xff]  ;;  %v302_v63 = vld [vmem:[#allocation2 + $0xf8] sm:$0xff] }
 0x158   : > { %v427_v6 = vpop.f32.mrf.mxu0  ;;  %v475_v7 = vpop.f32.mrf.mxu1 }
 0x159   : > { %548 = vst [vmem:[#allocation2 + $0xd8] sm:$0xff] %v516_v4  ;;  %564 = vst [vmem:[#allocation2 + $0x40] sm:$0xff] %v532_v5  ;;  %v517_v10 = vadd.f32 %v427_v6, %v276_v2  ;;  %v533_v11 = vadd.f32 %v475_v7, %v292_v3  ;;  %v287_v4 = vld [vmem:[#allocation2 + $0x8] sm:$0xff]  ;;  %v303_v5 = vld [vmem:[#allocation2 + $0x20] sm:$0xff] }
 0x15a   : > { %v431_v12 = vpop.f32.mrf.mxu0  ;;  %v479_v13 = vpop.f32.mrf.mxu1 }
 0x15b   : > { %549 = vst [vmem:[#allocation2 + $0x18] sm:$0xff] %v517_v10  ;;  %565 = vst [vmem:[#allocation2 + $0xc8] sm:$0xff] %v533_v11  ;;  %v518_v16 = vadd.f32 %v431_v12, %v277_v8  ;;  %v534_v17 = vadd.f32 %v479_v13, %v293_v9  ;;  %v288_v10 = vld [vmem:[#allocation2 + $0x78] sm:$0xff] }
 0x15c   : > { %v433_v18 = vpop.f32.mrf.mxu0  ;;  %v481_v19 = vpop.f32.mrf.mxu1  ;;  %v304_v11 = vld [vmem:[#allocation2 + $0x98] sm:$0xff] }
 0x15d   : > { %550 = vst [vmem:[#allocation2 + $0x50] sm:$0xff] %v518_v16  ;;  %566 = vst [vmem:[#allocation2 + $0xe0] sm:$0xff] %v534_v17  ;;  %v519_v22 = vadd.f32 %v433_v18, %v278_v14  ;;  %v535_v23 = vadd.f32 %v481_v19, %v294_v15 }
 0x15e   : > { %v437_v24 = vpop.f32.mrf.mxu0  ;;  %v485_v25 = vpop.f32.mrf.mxu1 }
 0x15f   : > { %551 = vst [vmem:[#allocation2 + $0x68] sm:$0xff] %v519_v22  ;;  %567 = vst [vmem:[#allocation2 + $0x90] sm:$0xff] %v535_v23  ;;  %v520_v28 = vadd.f32 %v437_v24, %v279_v20  ;;  %v536_v29 = vadd.f32 %v485_v25, %v295_v21 }
 0x160   : > { %v439_v30 = vpop.f32.mrf.mxu0  ;;  %v487_v31 = vpop.f32.mrf.mxu1 }
 0x161   : > { %552 = vst [vmem:[#allocation2 + $0x30] sm:$0xff] %v520_v28  ;;  %568 = vst [vmem:[#allocation2 + $0x70] sm:$0xff] %v536_v29  ;;  %v521_v34 = vadd.f32 %v439_v30, %v280_v26  ;;  %v537_v35 = vadd.f32 %v487_v31, %v296_v27 }
 0x162   : > { %v443_v36 = vpop.f32.mrf.mxu0  ;;  %v491_v37 = vpop.f32.mrf.mxu1 }
 0x163   : > { %553 = vst [vmem:[#allocation2 + $0x48] sm:$0xff] %v521_v34  ;;  %569 = vst [vmem:[#allocation2 + $0xc0] sm:$0xff] %v537_v35  ;;  %v522_v40 = vadd.f32 %v443_v36, %v281_v32  ;;  %v538_v41 = vadd.f32 %v491_v37, %v297_v33 }
 0x164   : > { %v445_v42 = vpop.f32.mrf.mxu0  ;;  %v493_v43 = vpop.f32.mrf.mxu1 }
 0x165   : > { %554 = vst [vmem:[#allocation2 + $0x80] sm:$0xff] %v522_v40  ;;  %570 = vst [vmem:[#allocation2 + $0xa8] sm:$0xff] %v538_v41  ;;  %v523_v46 = vadd.f32 %v445_v42, %v282_v38  ;;  %v539_v47 = vadd.f32 %v493_v43, %v298_v39 }
 0x166   : > { %v449_v48 = vpop.f32.mrf.mxu0  ;;  %v497_v49 = vpop.f32.mrf.mxu1 }
 0x167   : > { %555 = vst [vmem:[#allocation2 + $0x88] sm:$0xff] %v523_v46  ;;  %571 = vst [vmem:[#allocation2 + $0xd0] sm:$0xff] %v539_v47  ;;  %v524_v52 = vadd.f32 %v449_v48, %v283_v44  ;;  %v540_v53 = vadd.f32 %v497_v49, %v299_v45 }
 0x168   : > { %v451_v54 = vpop.f32.mrf.mxu0  ;;  %v499_v55 = vpop.f32.mrf.mxu1 }
 0x169   : > { %556 = vst [vmem:[#allocation2 + $0xe8] sm:$0xff] %v524_v52  ;;  %572 = vst [vmem:[#allocation2 + $0x10] sm:$0xff] %v540_v53  ;;  %v525_v58 = vadd.f32 %v451_v54, %v284_v50  ;;  %v541_v59 = vadd.f32 %v499_v55, %v300_v51 }
 0x16a   : > { %v455_v60 = vpop.f32.mrf.mxu0  ;;  %v503_v61 = vpop.f32.mrf.mxu1 }
 0x16b   : > { %557 = vst [vmem:[#allocation2 + $0xb8] sm:$0xff] %v525_v58  ;;  %573 = vst [vmem:[#allocation2 + $0x28] sm:$0xff] %v541_v59  ;;  %v526_v0 = vadd.f32 %v455_v60, %v285_v56  ;;  %v542_v1 = vadd.f32 %v503_v61, %v301_v57 }
 0x16c   : > { %v457_v2 = vpop.f32.mrf.mxu0  ;;  %v505_v3 = vpop.f32.mrf.mxu1 }
 0x16d   : > { %558 = vst [vmem:[#allocation2 + $0x60] sm:$0xff] %v526_v0  ;;  %574 = vst [vmem:[#allocation2 + $0xa0] sm:$0xff] %v542_v1  ;;  %v527_v6 = vadd.f32 %v457_v2, %v286_v62  ;;  %v543_v7 = vadd.f32 %v505_v3, %v302_v63 }
 0x16e   : > { %v461_v8 = vpop.f32.mrf.mxu0  ;;  %v509_v9 = vpop.f32.mrf.mxu1 }
 0x16f   : > { %559 = vst [vmem:[#allocation2 + $0xf0] sm:$0xff] %v527_v6  ;;  %575 = vst [vmem:[#allocation2 + $0xf8] sm:$0xff] %v543_v7  ;;  %v528_v12 = vadd.f32 %v461_v8, %v287_v4  ;;  %v544_v13 = vadd.f32 %v509_v9, %v303_v5  ;;  %581 = sbr.rel (%p797_p4) target bundleno = 389 (0x185), region = 44 }
 0x170   : > { %v463_v14 = vpop.f32.mrf.mxu0  ;;  %v511_v15 = vpop.f32.mrf.mxu1 }
 0x171   : > { %560 = vst [vmem:[#allocation2 + $0x8] sm:$0xff] %v528_v12  ;;  %576 = vst [vmem:[#allocation2 + $0x20] sm:$0xff] %v544_v13  ;;  %v529_v16 = vadd.f32 %v463_v14, %v288_v10  ;;  %v545_v17 = vadd.f32 %v511_v15, %v304_v11 }
 0x173   : > { %561 = vst [vmem:[#allocation2 + $0x78] sm:$0xff] %v529_v16  ;;  %577 = vst [vmem:[#allocation2 + $0x98] sm:$0xff] %v545_v17 }
 0x174   : > { %v582_v18 = vld [vmem:[#allocation2 + $0xb0] sm:$0xff]  ;;  %v583_v19 = vld [vmem:[#allocation2] sm:$0xff]  ;;  %v584_v20 = vld [vmem:[#allocation2 + $0xd8] sm:$0xff] }
 0x175   : > { %614 = vst [vmem:[%s1434_s24] sm:$0xff] %v582_v18  ;;  %615 = vst [vmem:[%s1434_s24 + $0x8] sm:$0xff] %v583_v19  ;;  %v585_v21 = vld [vmem:[#allocation2 + $0x18] sm:$0xff]  ;;  %v586_v22 = vld [vmem:[#allocation2 + $0x50] sm:$0xff] }
 0x176   : > { %616 = vst [vmem:[%s1434_s24 + $0x10] sm:$0xff] %v584_v20  ;;  %v587_v23 = vld [vmem:[#allocation2 + $0x68] sm:$0xff]  ;;  %617 = vst [vmem:[%s1434_s24 + $0x18] sm:$0xff] %v585_v21  ;;  %v588_v24 = vld [vmem:[#allocation2 + $0x30] sm:$0xff] }
 0x177   : > { %618 = vst [vmem:[%s1434_s24 + $0x20] sm:$0xff] %v586_v22  ;;  %619 = vst [vmem:[%s1434_s24 + $0x28] sm:$0xff] %v587_v23  ;;  %v589_v25 = vld [vmem:[#allocation2 + $0x48] sm:$0xff]  ;;  %v590_v26 = vld [vmem:[#allocation2 + $0x80] sm:$0xff] }
 0x178   : > { %620 = vst [vmem:[%s1434_s24 + $0x30] sm:$0xff] %v588_v24  ;;  %621 = vst [vmem:[%s1434_s24 + $0x38] sm:$0xff] %v589_v25  ;;  %v591_v27 = vld [vmem:[#allocation2 + $0x88] sm:$0xff]  ;;  %v593_v29 = vld [vmem:[#allocation2 + $0xb8] sm:$0xff] }
 0x179   : > { %622 = vst [vmem:[%s1434_s24 + $0x40] sm:$0xff] %v590_v26  ;;  %v592_v28 = vld [vmem:[#allocation2 + $0xe8] sm:$0xff]  ;;  %623 = vst [vmem:[%s1434_s24 + $0x48] sm:$0xff] %v591_v27  ;;  %v594_v30 = vld [vmem:[#allocation2 + $0x60] sm:$0xff] }
 0x17a   : > { %624 = vst [vmem:[%s1434_s24 + $0x50] sm:$0xff] %v592_v28  ;;  %625 = vst [vmem:[%s1434_s24 + $0x58] sm:$0xff] %v593_v29  ;;  %v595_v31 = vld [vmem:[#allocation2 + $0xf0] sm:$0xff]  ;;  %v596_v32 = vld [vmem:[#allocation2 + $0x8] sm:$0xff] }
 0x17b   : > { %626 = vst [vmem:[%s1434_s24 + $0x60] sm:$0xff] %v594_v30  ;;  %627 = vst [vmem:[%s1434_s24 + $0x68] sm:$0xff] %v595_v31  ;;  %v597_v33 = vld [vmem:[#allocation2 + $0x78] sm:$0xff]  ;;  %v600_v36 = vld [vmem:[#allocation2 + $0x40] sm:$0xff] }
 0x17c   : > { %628 = vst [vmem:[%s1434_s24 + $0x70] sm:$0xff] %v596_v32  ;;  %v598_v34 = vld [vmem:[#allocation2 + $0x38] sm:$0xff]  ;;  %629 = vst [vmem:[%s1434_s24 + $0x78] sm:$0xff] %v597_v33  ;;  %v601_v37 = vld [vmem:[#allocation2 + $0xc8] sm:$0xff] }
 0x17d   : > { %v599_v35 = vld [vmem:[#allocation2 + $0x58] sm:$0xff]  ;;  %630 = vst [vmem:[%s1434_s24 + $0x80] sm:$0xff] %v598_v34  ;;  %v602_v38 = vld [vmem:[#allocation2 + $0xe0] sm:$0xff]  ;;  %632 = vst [vmem:[%s1434_s24 + $0x90] sm:$0xff] %v600_v36 }
 0x17e   : > { %631 = vst [vmem:[%s1434_s24 + $0x88] sm:$0xff] %v599_v35  ;;  %633 = vst [vmem:[%s1434_s24 + $0x98] sm:$0xff] %v601_v37  ;;  %v603_v39 = vld [vmem:[#allocation2 + $0x90] sm:$0xff]  ;;  %v605_v41 = vld [vmem:[#allocation2 + $0xc0] sm:$0xff] }
 0x17f   : > { %634 = vst [vmem:[%s1434_s24 + $0xa0] sm:$0xff] %v602_v38  ;;  %v604_v40 = vld [vmem:[#allocation2 + $0x70] sm:$0xff]  ;;  %635 = vst [vmem:[%s1434_s24 + $0xa8] sm:$0xff] %v603_v39  ;;  %v606_v42 = vld [vmem:[#allocation2 + $0xa8] sm:$0xff] }
 0x180   : > { %636 = vst [vmem:[%s1434_s24 + $0xb0] sm:$0xff] %v604_v40  ;;  %637 = vst [vmem:[%s1434_s24 + $0xb8] sm:$0xff] %v605_v41  ;;  %v607_v43 = vld [vmem:[#allocation2 + $0xd0] sm:$0xff]  ;;  %v609_v45 = vld [vmem:[#allocation2 + $0x28] sm:$0xff] }
 0x181   : > { %v608_v44 = vld [vmem:[#allocation2 + $0x10] sm:$0xff]  ;;  %638 = vst [vmem:[%s1434_s24 + $0xc0] sm:$0xff] %v606_v42  ;;  %639 = vst [vmem:[%s1434_s24 + $0xc8] sm:$0xff] %v607_v43  ;;  %v610_v46 = vld [vmem:[#allocation2 + $0xa0] sm:$0xff] }
 0x182   : > { %640 = vst [vmem:[%s1434_s24 + $0xd0] sm:$0xff] %v608_v44  ;;  %v611_v47 = vld [vmem:[#allocation2 + $0xf8] sm:$0xff]  ;;  %641 = vst [vmem:[%s1434_s24 + $0xd8] sm:$0xff] %v609_v45  ;;  %v612_v48 = vld [vmem:[#allocation2 + $0x20] sm:$0xff] }
 0x183   : > { %642 = vst [vmem:[%s1434_s24 + $0xe0] sm:$0xff] %v610_v46  ;;  %643 = vst [vmem:[%s1434_s24 + $0xe8] sm:$0xff] %v611_v47  ;;  %v613_v49 = vld [vmem:[#allocation2 + $0x98] sm:$0xff] }
 0x184   : > { %644 = vst [vmem:[%s1434_s24 + $0xf0] sm:$0xff] %v612_v48  ;;  %645 = vst [vmem:[%s1434_s24 + $0xf8] sm:$0xff] %v613_v49 }
 0x185 PF: > { %s1640_s18 = sld [smem:[#allocation13_spill]]  ;;  %s663_s0 = sshll.u32 %s1434_s24, 4  ;;  %s1525_s0 = int_to_ptr.vmem [resolvable:$true] %s663_s0 }
 0x186   : > { %s1641_s28 = sld [smem:[#allocation20_spill]]  ;;  %s1529_s17 = scalar_lea.sflag [#allocation5], %s229_s4 }
 0x187   : > { %s1034_s5 = scalar_lea.vmem %s1525_s0, 4096  ;;  %s1193_s15 = smov [#allocation8]  }
 0x188   : > { %p1035_p7 = scmp.ne.s32.totalorder %s1525_s0, %s1034_s5  ;;  %s1038_s19 = sshll.u32 %s1193_s15, 4  ;;  %s1039_s19 = int_to_ptr.vmem [resolvable:$false] %s1038_s19 }
 0x189   : > { %s1040_s25 = scalar_lea.vmem %s1039_s19, 8192  ;;  %p1041_p0 = scmp.lt.s32.totalorder %s1525_s0, %s1039_s19 }
 0x18a   : > { %p1036_p10 = pnand %p1035_p7, %p1382_p13  ;;  %p1042_p6 = scmp.lt.s32.totalorder %s1040_s25, %s1034_s5 }
 0x18b   : > { %s803_s3 = sshll.u32 %s1640_s18, 8 }
 0x18c   : > { %s1522_s2 = scalar_lea.hbm %s1641_s28, %s803_s3  ;;  %p1037_p12 = pneg %p1036_p10 }
 0x18d   : > { %p1043_p9 = por %p1042_p6, %p1041_p0 }
 0x18f   : > { %p1044_p1 = pnand %p1043_p9, %p1037_p12 }
 0x191   : > { %1047 = shalt.err (!%p1044_p1)
}
 0x192   : > { %s1048_s21 = scalar_lea.hbm %s1522_s2, 4096  ;;  %s1052_s8 = scalar_lea.hbm %s1641_s28, 12288 }
 0x193   : > { %p1049_p2 = scmp.ne.s32.totalorder %s1522_s2, %s1048_s21  ;;  %p1053_p8 = scmp.lt.s32.totalorder %s1522_s2, %s1641_s28 }
 0x194   : > { %p1054_p4 = scmp.lt.s32.totalorder %s1052_s8, %s1048_s21 }
 0x195   : > { %p1050_p3 = pnand %p1049_p2, %p1382_p13 }
 0x196   : > { %p1055_p7 = por %p1054_p4, %p1053_p8 }
 0x197   : > { %p1051_p11 = pneg %p1050_p3 }
 0x199   : > { %p1056_p10 = pnand %p1055_p7, %p1051_p11 }
 0x19b   : > { %1059 = shalt.err (!%p1056_p10)
}
 0x19c   : > { %s1194_s24 = smov 256   ;;  %s1195_s18 = smov 768  }
 0x19d   : > { %s1196_s3 = smov 16  }
 0x19e   : > { %841 = dma.vmem_to_hbm [thread:$0]  (%p1382_p13), %s1525_s0, 4096, %s1522_s2, %s1529_s17, %s1194_s24, %s1195_s18, %s1196_s3  }
 0x19f PF: > { %p855_p12 = scmp.ge.s32.totalorder %s1182_s22, 2  ;;  %s678_s23 = sand.u32 1, %s1130_s9  }
 0x1a0   : > { %s679_s27 = scalar_lea.sflag [#allocation5], %s678_s23 }
 0x1a1   : > { %p851_p0 = pnand %p855_p12, %p1392_p5 }
 0x1a3   : > { %p852_p6 = pneg %p851_p0 }
 0x1a5   : > { %1125 = dma.done.wait (%p852_p6), %s679_s27, 4096  }
 0x1a6   : > { %1127 = vsyncadd (%p852_p6), %s679_s27, 4294963200  ;;  %s21_s22 = sadd.s32 1, %s1182_s22   ;;  %s1643_s29 = sld [smem:[#allocation18_spill]] }
 0x1a7   : > { %p1557_p9 = scmp.ge.s32.totalorder %s21_s22, 8   ;;  %s1644_s2 = sld [smem:[#allocation12_spill]] }
 0x1a8   : > { %s1645_s17 = sld [smem:[#allocation16_spill]]  ;;  %s1649_s9 = smov %s1134_s10 }
 0x1a9   : > { %s1646_s19 = sld [smem:[#allocation14_spill]]  ;;  %s1650_s10 = smov %s1138_s11 }
 0x1aa   : > { %s1647_s6 = sld [smem:[#allocation15_spill]]  ;;  %s1651_s11 = smov %s1387_s26 }
 0x1ab   : > { %s1648_s21 = sld [smem:[#allocation17_spill]]  ;;  %s1652_s12 = smov %s1146_s13 }
 0x1ac   : > { %s1653_s13 = smov %s1150_s14  ;;  %s1654_s14 = smov %s1643_s29 }
 0x1ad   : > { %s1655_s15 = smov %s1158_s16  ;;  %s1656_s16 = smov %s1644_s2 }
 0x1ae   : > { %s1657_s18 = smov %s1174_s20  ;;  %20 = sbr.rel (!%p1557_p9) target bundleno = 15 (0xf), region = 94 }
 0x1b0   : > { %s1658_s20 = smov %s1647_s6 }
 0x1b3   :  { %684 = vsyncpa [#allocation4], 1 }
 0x1b4   :  { %686 = vsyncpa [#allocation4 + $0x1], 1 }
 0x1b5   :  { %687 = vsyncpa [#allocation7], 1 }
 0x1b6   :  { %689 = vsyncpa [#allocation7 + $0x1], 1 }
 0x1b7   :  { %690 = vsyncpa [#allocation5], 1 }
 0x1b8   :  { %692 = vsyncpa [#allocation5 + $0x1], 1 }

</bundles_post_ra>
